<compile_context>
chip_gen: v6e
topology: v6e:2x2x1
jax: 0.10.0
libtpu: 0.0.40
codegen_flags: <defaults>
</compile_context>

<pallas_src>
import numpy as np
import jax
import jax.numpy as jnp
from jax.experimental import pallas as pl
from jax.experimental.pallas import tpu as pltpu

IN_DIMS = 16    # SparseGraphConvolution default in_dims
EMB_DIMS = 16   # embedding_dims


def sparse_gcn_kernel(
    graph_ref, edge_ref, cedge_ref, sgt_ref, csgt_ref, adj_ref, cadj_ref,
    w_ev_ref, b_ev_ref, w_cev_ref, b_cev_ref, w_g_ref, w_cg_ref, alpha_ref,
    out_ref,
):
  graph = graph_ref[0]                                   # (H*N, C) heads stacked on rows

  def gcn_path(edge, sgt_big, adj_big, w_ev, b_ev, w_g):
    # edge_value linear: one (H*E, EMB) @ (EMB, C) MXU pass for all heads.
    edge_v = jnp.dot(edge, w_ev, preferred_element_type=jnp.float32) + b_ev
    # 1/div once (row-sums of kron(I_H, S_G^T) are exactly div[n] per row h*N+n).
    inv_div = pl.reciprocal(jnp.sum(sgt_big, axis=1, keepdims=True))       # (H*N, 1)
    # shared edge -> node aggregation for every head in a single MXU pass.
    agg = jnp.dot(sgt_big, edge_v, preferred_element_type=jnp.float32)     # (H*N, C)
    value = graph + agg * inv_div
    # all per-head adjacency matmuls as one block-diagonal MXU pass.
    feat = jnp.dot(adj_big, value, preferred_element_type=jnp.float32)     # (H*N, C)
    # g_embedding / Cg_embedding (bias-free linear).
    return jnp.dot(feat, w_g, preferred_element_type=jnp.float32)          # (H*N, EMB)

  g_feat = gcn_path(edge_ref[0], sgt_ref[0], adj_ref[0],
                    w_ev_ref[...], b_ev_ref[...], w_g_ref[...])
  c_feat = gcn_path(cedge_ref[0], csgt_ref[0], cadj_ref[0],
                    w_cev_ref[...], b_cev_ref[...], w_cg_ref[...])

  s = g_feat + c_feat
  alpha = alpha_ref[0, 0]
  # PReLU; F.dropout(p=0) is the identity.  Single contiguous store per step.
  out_ref[0] = jnp.where(s >= 0.0, s, alpha * s).astype(out_ref.dtype)


def sparse_graph_convolution(graph, G_S, C_G_S, S_G, C_S_G, S_E, C_S_E, params):
  H, B, N, _ = graph.shape
  E = S_G.shape[1]
  C, EMB = IN_DIMS, EMB_DIMS

  # ---- wrapper-side layout plumbing (slice, permute, head-stacking) ----------
  spa = jnp.transpose(graph[:, :, :, 1:], (1, 0, 2, 3))            # (B,H,N,C)
  graph_rows = spa.reshape(B, H * N, C)
  edge_rows = S_E.reshape(B, H * E, EMB)
  cedge_rows = C_S_E.reshape(B, H * E, EMB)

  # kron(I_H, G^T): shares the edge->node contraction across all heads.
  # blockdiag_h(adjacency): all per-head adjacency matmuls in one pass.
  # TODO(synk): for large H*N this H^2 inflation of the adjacency inputs should
  # be replaced by a per-head grid axis; at these sizes it is negligible.
  eye = jnp.eye(H, dtype=graph.dtype)
  sgt_big = jnp.einsum('ij,bne->binje', eye,
                       jnp.swapaxes(S_G, 1, 2)).reshape(B, H * N, H * E)
  csgt_big = jnp.einsum('ij,bne->binje', eye,
                        jnp.swapaxes(C_S_G, 1, 2)).reshape(B, H * N, H * E)
  a_big = jnp.einsum('ij,bimn->bimjn', eye, G_S).reshape(B, H * N, H * N)
  ca_big = jnp.einsum('ij,bimn->bimjn', eye, C_G_S).reshape(B, H * N, H * N)

  batched = [graph_rows, edge_rows, cedge_rows, sgt_big, csgt_big, a_big, ca_big]
  weights = [params['w_ev'], params['b_ev'], params['w_cev'], params['b_cev'],
             params['w_g'], params['w_cg'], params['alpha']]

  def bspec(shape):
    nd = len(shape)
    return pl.BlockSpec((1,) + tuple(shape[1:]),
                        lambda b, _nd=nd: (b,) + (0,) * (_nd - 1))

  def wspec(shape):
    nd = len(shape)
    return pl.BlockSpec(tuple(shape), lambda b, _nd=nd: (0,) * _nd)

  in_specs = [bspec(a.shape) for a in batched] + [wspec(w.shape) for w in weights]
  out_specs = pl.BlockSpec((1, H * N, EMB), lambda b: (b, 0, 0))
  out_shape = jax.ShapeDtypeStruct((B, H * N, EMB), jnp.float32)

  feats = pl.pallas_call(
      sparse_gcn_kernel,
      out_shape=out_shape,
      grid_spec=pltpu.PrefetchScalarGridSpec(
          num_scalar_prefetch=0,
          grid=(B,),
          in_specs=in_specs,
          out_specs=out_specs,
      ),
      compiler_params=pltpu.CompilerParams(
          dimension_semantics=("parallel",)),     # batch is independent -> both v7x cores
  )(*batched, *weights)

  # (B, H*N, EMB) -> (B, H, N, EMB) -> permute(2,0,1,3) as in the PyTorch module.
  return jnp.transpose(feats.reshape(B, H, N, EMB), (2, 0, 1, 3))


sparse_graph_convolution = jax.jit(sparse_graph_convolution)


def init_params(key):
  ks = jax.random.split(key, 6)

  def linear(kw, kb, fan_in, fan_out):
    bound = 1.0 / np.sqrt(fan_in)
    w = jax.random.uniform(kw, (fan_in, fan_out), jnp.float32, -bound, bound)
    b = jax.random.uniform(kb, (1, fan_out), jnp.float32, -bound, bound)
    return w, b

  p = {}
  p['w_ev'], p['b_ev'] = linear(ks[0], ks[1], EMB_DIMS, IN_DIMS)    # edge_value
  p['w_cev'], p['b_cev'] = linear(ks[2], ks[3], EMB_DIMS, IN_DIMS)  # C_edge_value
  bound = 1.0 / np.sqrt(IN_DIMS)
  p['w_g'] = jax.random.uniform(ks[4], (IN_DIMS, EMB_DIMS), jnp.float32, -bound, bound)
  p['w_cg'] = jax.random.uniform(ks[5], (IN_DIMS, EMB_DIMS), jnp.float32, -bound, bound)
  p['alpha'] = jnp.full((1, 1), 0.25, jnp.float32)                  # PReLU weight
  return p


def reference(graph, G_S, C_G_S, S_G, C_S_G, S_E, C_S_E, p):
  """Pure-JAX mirror of the PyTorch forward for verification."""
  spa = jnp.transpose(graph[:, :, :, 1:], (1, 0, 2, 3))             # (B,H,N,C)

  div = jnp.sum(S_G, axis=1)[:, None, :, None]
  edge = S_E @ p['w_ev'] + p['b_ev'][0]
  value = spa + jnp.einsum('bmn,bhnc->bhmc', jnp.swapaxes(S_G, -1, -2), edge) / div
  g_feat = jnp.matmul(G_S, value) @ p['w_g']

  c_div = jnp.sum(C_S_G, axis=1)[:, None, :, None]
  c_edge = C_S_E @ p['w_cev'] + p['b_cev'][0]
  c_value = spa + jnp.einsum('bmn,bhnc->bhmc', jnp.swapaxes(C_S_G, -1, -2), c_edge) / c_div
  c_feat = jnp.matmul(C_G_S, c_value) @ p['w_cg']

  s = g_feat + c_feat
  act = jnp.where(s >= 0.0, s, p['alpha'][0, 0] * s)                # PReLU, dropout(p=0)=id
  return jnp.transpose(act, (2, 0, 1, 3))                           # (N,B,H,EMB)


if __name__ == "__main__":
  H, B, N, E = 4, 2, 8, 8
  key = jax.random.PRNGKey(0)
  ks = jax.random.split(key, 8)

  graph = jax.random.normal(ks[0], (H, B, N, IN_DIMS + 1), jnp.float32)
  G_S = jax.random.uniform(ks[1], (B, H, N, N), jnp.float32, 0.0, 1.0)
  C_G_S = jax.random.uniform(ks[2], (B, H, N, N), jnp.float32, 0.0, 1.0)
  # strictly positive so torch.sum(G, dim=1) (the divisor) is never zero
  S_G = jax.random.uniform(ks[3], (B, E, N), jnp.float32, 0.1, 1.0)
  C_S_G = jax.random.uniform(ks[4], (B, E, N), jnp.float32, 0.1, 1.0)
  S_E = jax.random.normal(ks[5], (B, H, E, EMB_DIMS), jnp.float32)
  C_S_E = jax.random.normal(ks[6], (B, H, E, EMB_DIMS), jnp.float32)
  params = init_params(ks[7])

  out = sparse_graph_convolution(graph, G_S, C_G_S, S_G, C_S_G, S_E, C_S_E, params)
  jax.block_until_ready(out)

  with jax.default_matmul_precision('highest'):
    ref = reference(graph, G_S, C_G_S, S_G, C_S_G, S_E, C_S_E, params)

  assert out.shape == (N, B, H, EMB_DIMS)
  assert np.allclose(np.asarray(out), np.asarray(ref), atol=2e-2, rtol=2e-2)

  print("KERNEL_OK")
</pallas_src>

<mosaic_0001>
module attributes {stable_mosaic.version = 11 : i64} {
  func.func @sparse_gcn_kernel(%arg0: i32, %arg1: memref<1x32x16xf32, #tpu.memory_space<vmem>>, %arg2: memref<1x32x16xf32, #tpu.memory_space<vmem>>, %arg3: memref<1x32x16xf32, #tpu.memory_space<vmem>>, %arg4: memref<1x32x32xf32, #tpu.memory_space<vmem>>, %arg5: memref<1x32x32xf32, #tpu.memory_space<vmem>>, %arg6: memref<1x32x32xf32, #tpu.memory_space<vmem>>, %arg7: memref<1x32x32xf32, #tpu.memory_space<vmem>>, %arg8: memref<16x16xf32, #tpu.memory_space<vmem>>, %arg9: memref<1x16xf32, #tpu.memory_space<vmem>>, %arg10: memref<16x16xf32, #tpu.memory_space<vmem>>, %arg11: memref<1x16xf32, #tpu.memory_space<vmem>>, %arg12: memref<16x16xf32, #tpu.memory_space<vmem>>, %arg13: memref<16x16xf32, #tpu.memory_space<vmem>>, %arg14: memref<1x1xf32, #tpu.memory_space<vmem>>, %arg15: memref<1x32x16xf32, #tpu.memory_space<vmem>>) attributes {dimension_semantics = [#tpu.dimension_semantics<parallel>], iteration_bounds = array<i64: 2>, scalar_prefetch = 0 : i64, scratch_operands = 0 : i64, tpu.core_type = #tpu.core_type<tc>, window_params = [{transform_indices = @transform_0, window_bounds = array<i64: 1, 32, 16>}, {transform_indices = @transform_1, window_bounds = array<i64: 1, 32, 16>}, {transform_indices = @transform_2, window_bounds = array<i64: 1, 32, 16>}, {transform_indices = @transform_3, window_bounds = array<i64: 1, 32, 32>}, {transform_indices = @transform_4, window_bounds = array<i64: 1, 32, 32>}, {transform_indices = @transform_5, window_bounds = array<i64: 1, 32, 32>}, {transform_indices = @transform_6, window_bounds = array<i64: 1, 32, 32>}, {pipeline_mode = #tpu.pipeline_mode<synchronous>, transform_indices = @transform_7, window_bounds = array<i64: 16, 16>}, {pipeline_mode = #tpu.pipeline_mode<synchronous>, transform_indices = @transform_8, window_bounds = array<i64: 1, 16>}, {pipeline_mode = #tpu.pipeline_mode<synchronous>, transform_indices = @transform_9, window_bounds = array<i64: 16, 16>}, {pipeline_mode = #tpu.pipeline_mode<synchronous>, transform_indices = @transform_10, window_bounds = array<i64: 1, 16>}, {pipeline_mode = #tpu.pipeline_mode<synchronous>, transform_indices = @transform_11, window_bounds = array<i64: 16, 16>}, {pipeline_mode = #tpu.pipeline_mode<synchronous>, transform_indices = @transform_12, window_bounds = array<i64: 16, 16>}, {pipeline_mode = #tpu.pipeline_mode<synchronous>, transform_indices = @transform_13, window_bounds = array<i64: 1, 1>}, {transform_indices = @transform_14, window_bounds = array<i64: 1, 32, 16>}]} {
    %c0 = arith.constant 0 : index
    %c0_0 = arith.constant 0 : index
    %c0_1 = arith.constant 0 : index
    %0 = vector.load %arg1[%c0, %c0_0, %c0_1] : memref<1x32x16xf32, #tpu.memory_space<vmem>>, vector<1x32x16xf32>
    %1 = vector.shape_cast %0 : vector<1x32x16xf32> to vector<32x16xf32>
    %c0_2 = arith.constant 0 : index
    %c0_3 = arith.constant 0 : index
    %c0_4 = arith.constant 0 : index
    %2 = vector.load %arg2[%c0_2, %c0_3, %c0_4] : memref<1x32x16xf32, #tpu.memory_space<vmem>>, vector<1x32x16xf32>
    %3 = vector.shape_cast %2 : vector<1x32x16xf32> to vector<32x16xf32>
    %c0_5 = arith.constant 0 : index
    %c0_6 = arith.constant 0 : index
    %c0_7 = arith.constant 0 : index
    %4 = vector.load %arg4[%c0_5, %c0_6, %c0_7] : memref<1x32x32xf32, #tpu.memory_space<vmem>>, vector<1x32x32xf32>
    %5 = vector.shape_cast %4 : vector<1x32x32xf32> to vector<32x32xf32>
    %c0_8 = arith.constant 0 : index
    %c0_9 = arith.constant 0 : index
    %c0_10 = arith.constant 0 : index
    %6 = vector.load %arg6[%c0_8, %c0_9, %c0_10] : memref<1x32x32xf32, #tpu.memory_space<vmem>>, vector<1x32x32xf32>
    %7 = vector.shape_cast %6 : vector<1x32x32xf32> to vector<32x32xf32>
    %c0_11 = arith.constant 0 : index
    %c0_12 = arith.constant 0 : index
    %8 = vector.load %arg8[%c0_11, %c0_12] : memref<16x16xf32, #tpu.memory_space<vmem>>, vector<16x16xf32>
    %c0_13 = arith.constant 0 : index
    %c0_14 = arith.constant 0 : index
    %9 = vector.load %arg9[%c0_13, %c0_14] : memref<1x16xf32, #tpu.memory_space<vmem>>, vector<1x16xf32>
    %c0_15 = arith.constant 0 : index
    %c0_16 = arith.constant 0 : index
    %10 = vector.load %arg12[%c0_15, %c0_16] : memref<16x16xf32, #tpu.memory_space<vmem>>, vector<16x16xf32>
    %cst = arith.constant dense<0.000000e+00> : vector<32x16xf32>
    %11 = tpu.matmul %3, %8, %cst {dimension_numbers = #tpu.dot_dimension_numbers<[1], [0], [0], [1], [0, 0, 1, 1], [], []>} : vector<32x16xf32>, vector<16x16xf32>, vector<32x16xf32> -> vector<32x16xf32>
    %12 = vector.broadcast %9 : vector<1x16xf32> to vector<32x16xf32>
    %13 = arith.addf %11, %12 : vector<32x16xf32>
    %cst_17 = arith.constant dense<0.000000e+00> : vector<32xf32>
    %14 = vector.multi_reduction <add>, %5, %cst_17 [1] : vector<32x32xf32> to vector<32xf32>
    %15 = vector.shape_cast %14 : vector<32xf32> to vector<32x1xf32>
    %16 = tpu.reciprocal %15 : vector<32x1xf32> -> vector<32x1xf32>
    %cst_18 = arith.constant dense<0.000000e+00> : vector<32x16xf32>
    %17 = tpu.matmul %5, %13, %cst_18 {dimension_numbers = #tpu.dot_dimension_numbers<[1], [0], [0], [1], [0, 0, 1, 1], [], []>} : vector<32x32xf32>, vector<32x16xf32>, vector<32x16xf32> -> vector<32x16xf32>
    %18 = vector.broadcast %16 : vector<32x1xf32> to vector<32x16xf32>
    %19 = arith.mulf %17, %18 : vector<32x16xf32>
    %20 = arith.addf %1, %19 : vector<32x16xf32>
    %cst_19 = arith.constant dense<0.000000e+00> : vector<32x16xf32>
    %21 = tpu.matmul %7, %20, %cst_19 {dimension_numbers = #tpu.dot_dimension_numbers<[1], [0], [0], [1], [0, 0, 1, 1], [], []>} : vector<32x32xf32>, vector<32x16xf32>, vector<32x16xf32> -> vector<32x16xf32>
    %cst_20 = arith.constant dense<0.000000e+00> : vector<32x16xf32>
    %22 = tpu.matmul %21, %10, %cst_20 {dimension_numbers = #tpu.dot_dimension_numbers<[1], [0], [0], [1], [0, 0, 1, 1], [], []>} : vector<32x16xf32>, vector<16x16xf32>, vector<32x16xf32> -> vector<32x16xf32>
    %c0_21 = arith.constant 0 : index
    %c0_22 = arith.constant 0 : index
    %c0_23 = arith.constant 0 : index
    %23 = vector.load %arg3[%c0_21, %c0_22, %c0_23] : memref<1x32x16xf32, #tpu.memory_space<vmem>>, vector<1x32x16xf32>
    %24 = vector.shape_cast %23 : vector<1x32x16xf32> to vector<32x16xf32>
    %c0_24 = arith.constant 0 : index
    %c0_25 = arith.constant 0 : index
    %c0_26 = arith.constant 0 : index
    %25 = vector.load %arg5[%c0_24, %c0_25, %c0_26] : memref<1x32x32xf32, #tpu.memory_space<vmem>>, vector<1x32x32xf32>
    %26 = vector.shape_cast %25 : vector<1x32x32xf32> to vector<32x32xf32>
    %c0_27 = arith.constant 0 : index
    %c0_28 = arith.constant 0 : index
    %c0_29 = arith.constant 0 : index
    %27 = vector.load %arg7[%c0_27, %c0_28, %c0_29] : memref<1x32x32xf32, #tpu.memory_space<vmem>>, vector<1x32x32xf32>
    %28 = vector.shape_cast %27 : vector<1x32x32xf32> to vector<32x32xf32>
    %c0_30 = arith.constant 0 : index
    %c0_31 = arith.constant 0 : index
    %29 = vector.load %arg10[%c0_30, %c0_31] : memref<16x16xf32, #tpu.memory_space<vmem>>, vector<16x16xf32>
    %c0_32 = arith.constant 0 : index
    %c0_33 = arith.constant 0 : index
    %30 = vector.load %arg11[%c0_32, %c0_33] : memref<1x16xf32, #tpu.memory_space<vmem>>, vector<1x16xf32>
    %c0_34 = arith.constant 0 : index
    %c0_35 = arith.constant 0 : index
    %31 = vector.load %arg13[%c0_34, %c0_35] : memref<16x16xf32, #tpu.memory_space<vmem>>, vector<16x16xf32>
    %cst_36 = arith.constant dense<0.000000e+00> : vector<32x16xf32>
    %32 = tpu.matmul %24, %29, %cst_36 {dimension_numbers = #tpu.dot_dimension_numbers<[1], [0], [0], [1], [0, 0, 1, 1], [], []>} : vector<32x16xf32>, vector<16x16xf32>, vector<32x16xf32> -> vector<32x16xf32>
    %33 = vector.broadcast %30 : vector<1x16xf32> to vector<32x16xf32>
    %34 = arith.addf %32, %33 : vector<32x16xf32>
    %cst_37 = arith.constant dense<0.000000e+00> : vector<32xf32>
    %35 = vector.multi_reduction <add>, %26, %cst_37 [1] : vector<32x32xf32> to vector<32xf32>
    %36 = vector.shape_cast %35 : vector<32xf32> to vector<32x1xf32>
    %37 = tpu.reciprocal %36 : vector<32x1xf32> -> vector<32x1xf32>
    %cst_38 = arith.constant dense<0.000000e+00> : vector<32x16xf32>
    %38 = tpu.matmul %26, %34, %cst_38 {dimension_numbers = #tpu.dot_dimension_numbers<[1], [0], [0], [1], [0, 0, 1, 1], [], []>} : vector<32x32xf32>, vector<32x16xf32>, vector<32x16xf32> -> vector<32x16xf32>
    %39 = vector.broadcast %37 : vector<32x1xf32> to vector<32x16xf32>
    %40 = arith.mulf %38, %39 : vector<32x16xf32>
    %41 = arith.addf %1, %40 : vector<32x16xf32>
    %cst_39 = arith.constant dense<0.000000e+00> : vector<32x16xf32>
    %42 = tpu.matmul %28, %41, %cst_39 {dimension_numbers = #tpu.dot_dimension_numbers<[1], [0], [0], [1], [0, 0, 1, 1], [], []>} : vector<32x32xf32>, vector<32x16xf32>, vector<32x16xf32> -> vector<32x16xf32>
    %cst_40 = arith.constant dense<0.000000e+00> : vector<32x16xf32>
    %43 = tpu.matmul %42, %31, %cst_40 {dimension_numbers = #tpu.dot_dimension_numbers<[1], [0], [0], [1], [0, 0, 1, 1], [], []>} : vector<32x16xf32>, vector<16x16xf32>, vector<32x16xf32> -> vector<32x16xf32>
    %44 = arith.addf %22, %43 : vector<32x16xf32>
    %c0_41 = arith.constant 0 : index
    %c0_42 = arith.constant 0 : index
    %45 = vector.load %arg14[%c0_41, %c0_42] : memref<1x1xf32, #tpu.memory_space<vmem>>, vector<1x1xf32>
    %46 = vector.extract %45[0, 0] : f32 from vector<1x1xf32>
    %cst_43 = arith.constant 0.000000e+00 : f32
    %47 = vector.broadcast %cst_43 : f32 to vector<32x16xf32>
    %48 = arith.cmpf oge, %44, %47 : vector<32x16xf32>
    %49 = vector.broadcast %46 : f32 to vector<32x16xf32>
    %50 = arith.mulf %49, %44 : vector<32x16xf32>
    %51 = arith.select %48, %44, %50 : vector<32x16xi1>, vector<32x16xf32>
    %c0_44 = arith.constant 0 : index
    %c0_45 = arith.constant 0 : index
    %c0_46 = arith.constant 0 : index
    %52 = vector.load %arg15[%c0_44, %c0_45, %c0_46] : memref<1x32x16xf32, #tpu.memory_space<vmem>>, vector<1x32x16xf32>
    %53 = vector.shape_cast %52 : vector<1x32x16xf32> to vector<32x16xf32>
    %54 = vector.shape_cast %51 : vector<32x16xf32> to vector<1x32x16xf32>
    tpu.vector_store %arg15[%c0_44, %c0_45, %c0_46], %54 {strides = array<i32>} : memref<1x32x16xf32, #tpu.memory_space<vmem>>, vector<1x32x16xf32>,
    return
  }
  func.func @transform_0(%arg0: i32) -> (i32, i32, i32) {
    %c0_i32 = arith.constant 0 : i32
    %c0_i32_0 = arith.constant 0 : i32
    %c0_i32_1 = arith.constant 0 : i32
    return %arg0, %c0_i32, %c0_i32_0 : i32, i32, i32
  }
  func.func @transform_1(%arg0: i32) -> (i32, i32, i32) {
    %c0_i32 = arith.constant 0 : i32
    %c0_i32_0 = arith.constant 0 : i32
    %c0_i32_1 = arith.constant 0 : i32
    return %arg0, %c0_i32, %c0_i32_0 : i32, i32, i32
  }
  func.func @transform_2(%arg0: i32) -> (i32, i32, i32) {
    %c0_i32 = arith.constant 0 : i32
    %c0_i32_0 = arith.constant 0 : i32
    %c0_i32_1 = arith.constant 0 : i32
    return %arg0, %c0_i32, %c0_i32_0 : i32, i32, i32
  }
  func.func @transform_3(%arg0: i32) -> (i32, i32, i32) {
    %c0_i32 = arith.constant 0 : i32
    %c0_i32_0 = arith.constant 0 : i32
    %c0_i32_1 = arith.constant 0 : i32
    return %arg0, %c0_i32, %c0_i32_0 : i32, i32, i32
  }
  func.func @transform_4(%arg0: i32) -> (i32, i32, i32) {
    %c0_i32 = arith.constant 0 : i32
    %c0_i32_0 = arith.constant 0 : i32
    %c0_i32_1 = arith.constant 0 : i32
    return %arg0, %c0_i32, %c0_i32_0 : i32, i32, i32
  }
  func.func @transform_5(%arg0: i32) -> (i32, i32, i32) {
    %c0_i32 = arith.constant 0 : i32
    %c0_i32_0 = arith.constant 0 : i32
    %c0_i32_1 = arith.constant 0 : i32
    return %arg0, %c0_i32, %c0_i32_0 : i32, i32, i32
  }
  func.func @transform_6(%arg0: i32) -> (i32, i32, i32) {
    %c0_i32 = arith.constant 0 : i32
    %c0_i32_0 = arith.constant 0 : i32
    %c0_i32_1 = arith.constant 0 : i32
    return %arg0, %c0_i32, %c0_i32_0 : i32, i32, i32
  }
  func.func @transform_7(%arg0: i32) -> (i32, i32) {
    %c0_i32 = arith.constant 0 : i32
    %c0_i32_0 = arith.constant 0 : i32
    %c0_i32_1 = arith.constant 0 : i32
    return %c0_i32, %c0_i32_0 : i32, i32
  }
  func.func @transform_8(%arg0: i32) -> (i32, i32) {
    %c0_i32 = arith.constant 0 : i32
    %c0_i32_0 = arith.constant 0 : i32
    %c0_i32_1 = arith.constant 0 : i32
    return %c0_i32, %c0_i32_0 : i32, i32
  }
  func.func @transform_9(%arg0: i32) -> (i32, i32) {
    %c0_i32 = arith.constant 0 : i32
    %c0_i32_0 = arith.constant 0 : i32
    %c0_i32_1 = arith.constant 0 : i32
    return %c0_i32, %c0_i32_0 : i32, i32
  }
  func.func @transform_10(%arg0: i32) -> (i32, i32) {
    %c0_i32 = arith.constant 0 : i32
    %c0_i32_0 = arith.constant 0 : i32
    %c0_i32_1 = arith.constant 0 : i32
    return %c0_i32, %c0_i32_0 : i32, i32
  }
  func.func @transform_11(%arg0: i32) -> (i32, i32) {
    %c0_i32 = arith.constant 0 : i32
    %c0_i32_0 = arith.constant 0 : i32
    %c0_i32_1 = arith.constant 0 : i32
    return %c0_i32, %c0_i32_0 : i32, i32
  }
  func.func @transform_12(%arg0: i32) -> (i32, i32) {
    %c0_i32 = arith.constant 0 : i32
    %c0_i32_0 = arith.constant 0 : i32
    %c0_i32_1 = arith.constant 0 : i32
    return %c0_i32, %c0_i32_0 : i32, i32
  }
  func.func @transform_13(%arg0: i32) -> (i32, i32) {
    %c0_i32 = arith.constant 0 : i32
    %c0_i32_0 = arith.constant 0 : i32
    %c0_i32_1 = arith.constant 0 : i32
    return %c0_i32, %c0_i32_0 : i32, i32
  }
  func.func @transform_14(%arg0: i32) -> (i32, i32, i32) {
    %c0_i32 = arith.constant 0 : i32
    %c0_i32_0 = arith.constant 0 : i32
    %c0_i32_1 = arith.constant 0 : i32
    return %arg0, %c0_i32, %c0_i32_0 : i32, i32, i32
  }
}

</mosaic_0001>

<bundles_post_ra>
// kernel: sparse_graph_convolution.1
= control target key start
LH: loop header
LB: loop body
LE: loop exit
PB: predicated region body
PF: predicated region fallthrough
CT: control target
= control target key end

     0   :  { %s1941_s15 = smov 0   ;;  %s2104_s0 = inlined_call_operand.vmem [shape: f32[2,32,16], index: 0, kind: input, shape index: {}]   ;;  %s2105_s1 = inlined_call_operand.vmem [shape: f32[2,32,16], index: 1, kind: input, shape index: {}]   ;;  %s2106_s2 = inlined_call_operand.vmem [shape: f32[2,32,16], index: 2, kind: input, shape index: {}]   ;;  %s2107_s3 = inlined_call_operand.vmem [shape: f32[2,32,32], index: 3, kind: input, shape index: {}]   ;;  %s2108_s4 = inlined_call_operand.vmem [shape: f32[2,32,32], index: 4, kind: input, shape index: {}]   ;;  %s2109_s5 = inlined_call_operand.vmem [shape: f32[2,32,32], index: 5, kind: input, shape index: {}]   ;;  %s2110_s6 = inlined_call_operand.vmem [shape: f32[2,32,32], index: 6, kind: input, shape index: {}]   ;;  %s2111_s7 = inlined_call_operand.vmem [shape: f32[16,16], index: 7, kind: input, shape index: {}]   ;;  %s2112_s8 = inlined_call_operand.vmem [shape: f32[1,16], index: 8, kind: input, shape index: {}]   ;;  %s2113_s9 = inlined_call_operand.vmem [shape: f32[16,16], index: 9, kind: input, shape index: {}]   ;;  %s2114_s10 = inlined_call_operand.vmem [shape: f32[1,16], index: 10, kind: input, shape index: {}]   ;;  %s2115_s11 = inlined_call_operand.vmem [shape: f32[16,16], index: 11, kind: input, shape index: {}]   ;;  %s2116_s12 = inlined_call_operand.vmem [shape: f32[16,16], index: 12, kind: input, shape index: {}]   ;;  %s2117_s13 = inlined_call_operand.<no memory space> [shape: f32[1,1], index: 13, kind: input, shape index: {}]   ;;  %s2118_s14 = inlined_call_operand.vmem [shape: f32[2,32,16], index: 14, kind: output, shape index: {}]  }
   0x1   :  { %v19_v0 = vstv %s2117_s13 }
   0x2   :  { %20 = vst [vmem:[#allocation2] sm:$0x1] %v19_v0 }
   0x3 LB: > { %s1612_s16 = sadd.s32 4294967295, %s1861_s15   ;;  %p1616_p0 = scmp.ge.s32.totalorder %s1861_s15, 1  ;;  %s1861_s15 = sphi %s1941_s15, %s26_s15  }
   0x4   : > { %p474_p1 = scmp.lt.s32.totalorder %s1861_s15, 3 }
   0x6   : > { %p475_p2 = pnand %p1616_p0, %p474_p1 }
   0x7   : > { %p550_p3 = scmp.lt.s32.totalorder (!%p475_p2), %s1612_s16, 1 }
   0x8   : > { %478 = sbr.rel (%p475_p2) target bundleno = 1052 (0x41c), region = 76 }
   0xd   : > { %v607_v1 = vld [vmem:[%s2111_s7 + $0x8] sm:$0xff]  ;;  %v606_v2 = vld [vmem:[%s2111_s7] sm:$0xff]  ;;  %s2120_s16 = smov (!%p550_p3, %s1612_s16), 1  ;;  %vm617_vm0 = vcmask 130048   ;;  %vm715_vm1 = vcmask 261120  }
   0xe   : > { %1733 = vmatprep.subr.mxu0 %v607_v1  ;;  %s1955_s20 = sshll.u32 %s2120_s16, 5  ;;  %v1633_v17 = vld [vmem:[%s2112_s8] ss:$0 sm:$0xff]  ;;  %v947_v24 = vld [vmem:[%s2113_s9 + $0x8] sm:$0xff] }
   0xf   : > { %1734 = vmatpush3.msra.mxu0 %v607_v1  ;;  %s559_s23 = scalar_lea.vmem %s2105_s1, %s1955_s20  ;;  %s569_s26 = scalar_lea.vmem %s2107_s3, %s1955_s20  ;;  %v946_v25 = vld [vmem:[%s2113_s9] sm:$0xff] }
  0x10   : > { %1735 = vmatprep.subr.mxu0 %v606_v2  ;;  %v594_v3 = vld [vmem:[%s559_s23] sm:$0xff]  ;;  %v595_v4 = vld [vmem:[%s559_s23 + $0x8] sm:$0xff]  ;;  %v596_v5 = vld [vmem:[%s559_s23 + $0x10] sm:$0xff]  ;;  %s564_s19 = scalar_lea.vmem %s2106_s2, %s1955_s20  ;;  %s554_s29 = scalar_lea.vmem %s2104_s0, %s1955_s20 }
  0x11   : > { %1736 = vmatpush3.msra.mxu0 %v606_v2  ;;  %1737 = vmatprep.mubr.msk.f32.mxu0 %vm617_vm0, %v594_v3  ;;  %v597_v6 = vld [vmem:[%s559_s23 + $0x18] sm:$0xff]  ;;  %v598_v7 = vld [vmem:[%s569_s26] sm:$0xff]  ;;  %v599_v8 = vld [vmem:[%s569_s26 + $0x8] sm:$0xff]  ;;  %s1998_s23 = scalar_lea.vmem %s2109_s5, %s1955_s20  ;;  %s2059_s13 = scalar_lea.vmem %s2110_s6, %s1955_s20 }
  0x12   : > { %1738 = vmatmul.mubr.msk.f32.vlgmr.msra.gmra.mxu0 %vm617_vm0, %v595_v4  ;;  %1751 = vmatprep.mubr.msk.f32.mxu1 %vm715_vm1, %v598_v7  ;;  %v601_v9 = vld [vmem:[%s569_s26 + $0x18] sm:$0xff]  ;;  %v719_v10 = vsel %vm715_vm1, %v599_v8, 0.0  ;;  %v600_v12 = vld [vmem:[%s569_s26 + $0x10] sm:$0xff]  ;;  %v716_v13 = vsel %vm715_vm1, %v598_v7, 0.0  ;;  %v934_v26 = vld [vmem:[%s564_s19] sm:$0xff]  ;;  %s574_s26 = scalar_lea.vmem %s2108_s4, %s1955_s20  ;;  %s589_s16 = scalar_lea.vmem %s2118_s14, %s1955_s20 }
  0x13   : > { %1740 = vmatprep.mubr.msk.f32.mxu0 %vm617_vm0, %v596_v5  ;;  %v725_v11 = vsel %vm715_vm1, %v601_v9, 0.0  ;;  %720 = vadd.xlane.f32.xlu1 %v719_v10  ;;  %v722_v14 = vsel %vm715_vm1, %v600_v12, 0.0  ;;  %v935_v27 = vld [vmem:[%s564_s19 + $0x8] sm:$0xff]  ;;  %v936_v28 = vld [vmem:[%s564_s19 + $0x10] sm:$0xff]  ;;  %v937_v29 = vld [vmem:[%s564_s19 + $0x18] sm:$0xff] }
  0x14   : > { %726 = vadd.xlane.f32.xlu0 %v725_v11  ;;  %v602_v30 = vld [vmem:[%s1998_s23] sm:$0xff]  ;;  %v2006_v31 = vld [vmem:[%s574_s26 + $0x10] sm:$0xff]  ;;  %v2008_v32 = vld [vmem:[%s574_s26 + $0x18] sm:$0xff] }
  0x15   : > { %v1063_v33 = vsel %vm715_vm1, %v2008_v32, 0.0  ;;  %v1060_v34 = vsel %vm715_vm1, %v2006_v31, 0.0  ;;  %v2014_v35 = vld [vmem:[%s574_s26] sm:$0xff]  ;;  %v2016_v36 = vld [vmem:[%s574_s26 + $0x8] sm:$0xff]  ;;  %v2026_v48 = vld [vmem:[%s554_s29 + $0x18] sm:$0xff] }
  0x16   : > { %1741 = vmatmul.mubr.msk.f32.gmra.mxu0 %vm617_vm0, %v597_v6  ;;  %v1057_v37 = vsel %vm715_vm1, %v2016_v36, 0.0  ;;  %v1054_v38 = vsel %vm715_vm1, %v2014_v35, 0.0  ;;  %v2028_v52 = vld [vmem:[%s554_s29 + $0x10] sm:$0xff]  ;;  %v2031_v57 = vld [vmem:[%s554_s29 + $0x8] sm:$0xff]  ;;  %v2034_v61 = vld [vmem:[%s554_s29] sm:$0xff] }
  0x17   : > { %717 = vadd.xlane.f32.xlu1 %v716_v13  ;;  %1765 = vmatprep.mubr.msk.f32.mxu0 %vm715_vm1, %v602_v30  ;;  %v1646_v0 = vld [vmem:[%s2114_s10] ss:$0 sm:$0xff]  ;;  %v603_v5 = vld [vmem:[%s1998_s23 + $0x8] sm:$0xff]  ;;  %v604_v6 = vld [vmem:[%s1998_s23 + $0x10] sm:$0xff] }
  0x18   : > { %723 = vadd.xlane.f32.xlu0 %v722_v14  ;;  %v942_v11 = vld [vmem:[%s2059_s13] sm:$0xff] }
  0x1b   : > { %1061 = vadd.xlane.f32.xlu1 %v1060_v34 }
  0x1c   : > { %1064 = vadd.xlane.f32.xlu0 %v1063_v33 }
  0x1f   : > { %1055 = vadd.xlane.f32.xlu1 %v1054_v38  ;;  %v610_v38 = vld [vmem:[%s2115_s11 + $0x8] sm:$0xff] }
  0x20   : > { %1058 = vadd.xlane.f32.xlu0 %v1057_v37  ;;  %v943_v37 = vld [vmem:[%s2059_s13 + $0x8] sm:$0xff] }
  0x9c   : > { %v721_v40 = vpop.xlane.xlu1 %720 }
  0x9d   : > { %v727_v39 = vpop.xlane.xlu0 %726  ;;  %1839 = vrcp.f32 %v721_v40  ;;  %v609_v40 = vld [vmem:[%s2115_s11] sm:$0xff] }
  0x9e   : > { %1841 = vrcp.f32 %v727_v39  ;;  %v944_v39 = vld [vmem:[%s2059_s13 + $0x10] sm:$0xff] }
  0xa0   : > { %v718_v42 = vpop.xlane.xlu1 %717 }
  0xa1   : > { %v724_v41 = vpop.xlane.xlu0 %723 }
  0xa2   : > { %1843 = vrcp.f32 %v724_v41  ;;  %v945_v41 = vld [vmem:[%s2059_s13 + $0x18] sm:$0xff] }
  0xa3   : > { %1845 = vrcp.f32 %v718_v42  ;;  %v949_v42 = vld [vmem:[%s2116_s12] sm:$0xff] }
  0xa4   : > { %v1062_v14 = vpop.xlane.xlu1 %1061 }
  0xa5   : > { %v1065_v13 = vpop.xlane.xlu0 %1064 }
  0xa6   : > { %1847 = vrcp.f32 %v1065_v13 }
  0xa7   : > { %1849 = vrcp.f32 %v1062_v14 }
  0xaa   : > { %v1840_v44 = vpop.eup %1839 }
  0xab   : > { %v1842_v46 = vpop.eup %1841 }
  0xaf   : > { %v1844_v47 = vpop.eup %1843 }
  0xb0   : > { %v1846_v51 = vpop.eup %1845 }
  0xd2   : > { %v1739_v15 = vpop.f32.mrf.mxu0 }
  0xd3   : > { %v702_v22 = vadd.f32 %v1739_v15, %v1633_v17  ;;  %v1059_v15 = vpop.xlane.xlu0 %1058 }
  0xd4   : > { %v696_v16 = vpop.f32.mrf.mxu0  ;;  %1851 = vrcp.f32 %v1059_v15 }
  0xd5   : > { %v697_v23 = vadd.f32 %v1633_v17, %v696_v16  ;;  %v1056_v16 = vpop.xlane.xlu1 %1055 }
  0xd6   : > { %v1742_v18 = vpop.f32.mrf.mxu0  ;;  %1853 = vrcp.f32 %v1056_v16 }
  0xd7   : > { %v712_v19 = vadd.f32 %v1742_v18, %v1633_v17 }
  0xd8   : > { %v706_v20 = vpop.f32.mrf.mxu0 }
  0xd9   : > { %v707_v21 = vadd.f32 %v1633_v17, %v706_v20  ;;  %1743 = vmatprep.subr.mxu1 %v712_v19 }
  0xda   : > { %1744 = vmatpush3.msra.mxu1 %v712_v19 }
  0xdb   : > { %1745 = vmatprep.subr.mxu1 %v707_v21 }
  0xdc   : > { %1746 = vmatpush3.msra.mxu1 %v707_v21 }
  0xdd   : > { %1747 = vmatprep.subr.mxu1 %v702_v22 }
  0xde   : > { %1748 = vmatpush3.msra.mxu1 %v702_v22  ;;  %v1848_v22 = vpop.eup %1847 }
  0xdf   : > { %1749 = vmatprep.subr.mxu1 %v697_v23 }
  0xe0   : > { %1750 = vmatpush3.msra.mxu1 %v697_v23 }
  0xe1   : > { %1752 = vmatmul.mubr.msk.f32.vlgmr.msra.gmra.mxu1 %vm715_vm1, %v599_v8  ;;  %1771 = vmatprep.subr.mxu1 %v947_v24  ;;  %v605_v8 = vld [vmem:[%s1998_s23 + $0x18] sm:$0xff] }
  0xe2   : > { %1754 = vmatprep.mubr.msk.f32.mxu1 %vm715_vm1, %v600_v12  ;;  %1772 = vmatpush3.msra.mxu1 %v947_v24  ;;  %v950_v12 = vld [vmem:[%s2116_s12 + $0x8] sm:$0xff]  ;;  %v1850_v24 = vpop.eup %1849 }
  0xe3   : > { %1773 = vmatprep.subr.mxu1 %v946_v25 }
  0xe4   : > { %1774 = vmatpush3.msra.mxu1 %v946_v25  ;;  %v1852_v25 = vpop.eup %1851 }
  0xe5   : > { %1755 = vmatmul.mubr.msk.f32.gmra.mxu1 %vm715_vm1, %v601_v9 }
  0xe6   : > { %1775 = vmatprep.mubr.msk.f32.mxu1 %vm617_vm0, %v934_v26 }
  0xe9   : > { %1776 = vmatmul.mubr.msk.f32.vlgmr.msra.gmra.mxu1 %vm617_vm0, %v935_v27 }
  0xea   : > { %1778 = vmatprep.mubr.msk.f32.mxu1 %vm617_vm0, %v936_v28  ;;  %v1854_v28 = vpop.eup %1853 }
  0xed   : > { %1779 = vmatmul.mubr.msk.f32.gmra.mxu1 %vm617_vm0, %v937_v29 }
  0xee   : > { %1803 = vmatprep.mubr.msk.f32.mxu1 %vm715_vm1, %v942_v11 }
 0x1a1   : > { %v1753_v43 = vpop.f32.mrf.mxu1 }
 0x1a2   : > { %v830_v54 = vmul.f32 %v1840_v44, %v1753_v43  ;;  %v1466_v43 = vld [vmem:[#allocation2] sm:$0x1] }
 0x1a3   : > { %v810_v45 = vpop.f32.mrf.mxu1  ;;  %1829 = vpush %v1466_v43 }
 0x1a4   : > { %v829_v59 = vmul.f32 %v1846_v51, %v810_v45  ;;  %v834_v63 = vadd.f32 %v830_v54, %v2031_v57 }
 0x1a5   : > { %v1756_v49 = vpop.f32.mrf.mxu1 }
 0x1a6   : > { %v832_v50 = vmul.f32 %v1842_v46, %v1756_v49  ;;  %v833_v2 = vadd.f32 %v829_v59, %v2034_v61 }
 0x1a7   : > { %v820_v53 = vpop.f32.mrf.mxu1 }
 0x1a8   : > { %v836_v55 = vadd.f32 %v832_v50, %v2026_v48  ;;  %v831_v56 = vmul.f32 %v1844_v47, %v820_v53 }
 0x1a9   : > { %v1777_v58 = vpop.f32.mrf.mxu1 }
 0x1aa   : > { %v835_v60 = vadd.f32 %v831_v56, %v2028_v52  ;;  %1757 = vmatprep.subr.mxu0 %v836_v55  ;;  %v1041_v9 = vadd.f32 %v1777_v58, %v1646_v0 }
 0x1ab   : > { %1758 = vmatpush3.msra.mxu0 %v836_v55  ;;  %v1035_v62 = vpop.f32.mrf.mxu1 }
 0x1ac   : > { %1759 = vmatprep.subr.mxu0 %v835_v60  ;;  %v1036_v10 = vadd.f32 %v1646_v0, %v1035_v62 }
 0x1ad   : > { %1760 = vmatpush3.msra.mxu0 %v835_v60  ;;  %v1780_v1 = vpop.f32.mrf.mxu1 }
 0x1ae   : > { %v1051_v3 = vadd.f32 %v1780_v1, %v1646_v0  ;;  %1761 = vmatprep.subr.mxu0 %v834_v63 }
 0x1af   : > { %1762 = vmatpush3.msra.mxu0 %v834_v63  ;;  %v1045_v4 = vpop.f32.mrf.mxu1 }
 0x1b0   : > { %1763 = vmatprep.subr.mxu0 %v833_v2  ;;  %v1046_v7 = vadd.f32 %v1646_v0, %v1045_v4 }
 0x1b1   : > { %1764 = vmatpush3.msra.mxu0 %v833_v2 }
 0x1b2   : > { %1766 = vmatmul.mubr.msk.f32.vlgmr.msra.gmra.mxu0 %vm715_vm1, %v603_v5  ;;  %1781 = vmatprep.subr.mxu0 %v1051_v3 }
 0x1b3   : > { %1782 = vmatpush3.msra.mxu0 %v1051_v3  ;;  %1768 = vmatprep.mubr.msk.f32.mxu0 %vm715_vm1, %v604_v6 }
 0x1b4   : > { %1783 = vmatprep.subr.mxu0 %v1046_v7 }
 0x1b5   : > { %1784 = vmatpush3.msra.mxu0 %v1046_v7 }
 0x1b6   : > { %1769 = vmatmul.mubr.msk.f32.gmra.mxu0 %vm715_vm1, %v605_v8  ;;  %1785 = vmatprep.subr.mxu0 %v1041_v9 }
 0x1b7   : > { %1786 = vmatpush3.msra.mxu0 %v1041_v9  ;;  %1789 = vmatprep.mubr.msk.f32.mxu0 %vm715_vm1, %v2014_v35 }
 0x1b8   : > { %1787 = vmatprep.subr.mxu0 %v1036_v10 }
 0x1b9   : > { %1788 = vmatpush3.msra.mxu0 %v1036_v10 }
 0x1ba   : > { %1790 = vmatmul.mubr.msk.f32.vlgmr.msra.gmra.mxu0 %vm715_vm1, %v2016_v36  ;;  %1809 = vmatprep.subr.mxu0 %v950_v12 }
 0x1bb   : > { %1792 = vmatprep.mubr.msk.f32.mxu0 %vm715_vm1, %v2006_v31  ;;  %1810 = vmatpush3.msra.mxu0 %v950_v12 }
 0x1bc   : > { %1811 = vmatprep.subr.mxu0 %v949_v42 }
 0x1bd   : > { %1812 = vmatpush3.msra.mxu0 %v949_v42 }
 0x1be   : > { %1793 = vmatmul.mubr.msk.f32.gmra.mxu0 %vm715_vm1, %v2008_v32 }
 0x1d4   : > { %s1830_s28 = spop %1829 }
 0x1d5   : > { %v1472_v51 = vstv %s1830_s28 }
 0x272   : > { %v1767_v17 = vpop.f32.mrf.mxu0 }
 0x274   : > { %v915_v18 = vpop.f32.mrf.mxu0 }
 0x276   : > { %v1770_v19 = vpop.f32.mrf.mxu0 }
 0x278   : > { %v925_v20 = vpop.f32.mrf.mxu0 }
 0x27a   : > { %v1791_v21 = vpop.f32.mrf.mxu0 }
 0x27b   : > { %v1168_v30 = vmul.f32 %v1852_v25, %v1791_v21 }
 0x27c   : > { %v1148_v23 = vpop.f32.mrf.mxu0 }
 0x27d   : > { %v1167_v33 = vmul.f32 %v1854_v28, %v1148_v23  ;;  %v1172_v35 = vadd.f32 %v1168_v30, %v2031_v57 }
 0x27e   : > { %v1794_v26 = vpop.f32.mrf.mxu0 }
 0x27f   : > { %v1170_v27 = vmul.f32 %v1848_v22, %v1794_v26  ;;  %v1171_v36 = vadd.f32 %v1167_v33, %v2034_v61 }
 0x280   : > { %v1158_v29 = vpop.f32.mrf.mxu0 }
 0x281   : > { %v1174_v31 = vadd.f32 %v1170_v27, %v2026_v48  ;;  %v1169_v32 = vmul.f32 %v1850_v24, %v1158_v29 }
 0x283   : > { %v1173_v34 = vadd.f32 %v1169_v32, %v2028_v52  ;;  %1795 = vmatprep.subr.mxu1 %v1174_v31 }
 0x284   : > { %1796 = vmatpush3.msra.mxu1 %v1174_v31 }
 0x285   : > { %1797 = vmatprep.subr.mxu1 %v1173_v34 }
 0x286   : > { %1798 = vmatpush3.msra.mxu1 %v1173_v34 }
 0x287   : > { %1799 = vmatprep.subr.mxu1 %v1172_v35 }
 0x288   : > { %1800 = vmatpush3.msra.mxu1 %v1172_v35 }
 0x289   : > { %1801 = vmatprep.subr.mxu1 %v1171_v36 }
 0x28a   : > { %1802 = vmatpush3.msra.mxu1 %v1171_v36 }
 0x28b   : > { %1804 = vmatmul.mubr.msk.f32.vlgmr.msra.gmra.mxu1 %vm715_vm1, %v943_v37  ;;  %1819 = vmatprep.subr.mxu1 %v610_v38 }
 0x28c   : > { %1806 = vmatprep.mubr.msk.f32.mxu1 %vm715_vm1, %v944_v39  ;;  %1820 = vmatpush3.msra.mxu1 %v610_v38 }
 0x28d   : > { %1821 = vmatprep.subr.mxu1 %v609_v40 }
 0x28e   : > { %1822 = vmatpush3.msra.mxu1 %v609_v40 }
 0x28f   : > { %1807 = vmatmul.mubr.msk.f32.gmra.mxu1 %vm715_vm1, %v945_v41 }
 0x290   : > { %1823 = vmatprep.mubr.msk.f32.mxu1 %vm617_vm0, %v915_v18 }
 0x293   : > { %1824 = vmatmul.mubr.msk.f32.vlgmr.msra.gmra.mxu1 %vm617_vm0, %v1767_v17 }
 0x294   : > { %1826 = vmatprep.mubr.msk.f32.mxu1 %vm617_vm0, %v925_v20 }
 0x297   : > { %1827 = vmatmul.mubr.msk.f32.gmra.mxu1 %vm617_vm0, %v1770_v19 }
 0x34b   : > { %v1805_v44 = vpop.f32.mrf.mxu1 }
 0x34d   : > { %v1253_v45 = vpop.f32.mrf.mxu1 }
 0x34e   : > { %1813 = vmatprep.mubr.msk.f32.mxu0 %vm617_vm0, %v1253_v45 }
 0x34f   : > { %v1808_v46 = vpop.f32.mrf.mxu1  ;;  %1814 = vmatmul.mubr.msk.f32.vlgmr.msra.gmra.mxu0 %vm617_vm0, %v1805_v44 }
 0x351   : > { %v1263_v47 = vpop.f32.mrf.mxu1 }
 0x352   : > { %1816 = vmatprep.mubr.msk.f32.mxu0 %vm617_vm0, %v1263_v47 }
 0x353   : > { %1817 = vmatmul.mubr.msk.f32.gmra.mxu0 %vm617_vm0, %v1808_v46  ;;  %v1825_v48 = vpop.f32.mrf.mxu1 }
 0x355   : > { %v1447_v49 = vpop.f32.mrf.mxu1 }
 0x357   : > { %v1828_v53 = vpop.f32.mrf.mxu1 }
 0x359   : > { %v1457_v61 = vpop.f32.mrf.mxu1 }
 0x40f   : > { %v1815_v50 = vpop.f32.mrf.mxu0 }
 0x410   : > { %v1453_v52 = vadd.f32 %v1825_v48, %v1815_v50 }
 0x411   : > { %v1350_v54 = vpop.f32.mrf.mxu0 }
 0x412   : > { %vm1469_vm2 = vcmp.ge.f32.partialorder %v1453_v52, 0.0  ;;  %v1474_v55 = vmul.f32 %v1472_v51, %v1453_v52  ;;  %v1448_v56 = vadd.f32 %v1447_v49, %v1350_v54 }
 0x413   : > { %v1818_v57 = vpop.f32.mrf.mxu0 }
 0x414   : > { %v1478_v58 = vsel %vm1469_vm2, %v1453_v52, %v1474_v55  ;;  %vm1468_vm3 = vcmp.ge.f32.partialorder %v1448_v56, 0.0  ;;  %v1473_v59 = vmul.f32 %v1472_v51, %v1448_v56  ;;  %v1463_v60 = vadd.f32 %v1828_v53, %v1818_v57 }
 0x415   : > { %1482 = vst.msk [vmem:[%s589_s16 + $0x8] sm:$0xff] %vm617_vm0, %v1478_v58  ;;  %v1360_v62 = vpop.f32.mrf.mxu0 }
 0x416   : > { %v1477_v63 = vsel %vm1468_vm3, %v1448_v56, %v1473_v59  ;;  %vm1471_vm4 = vcmp.ge.f32.partialorder %v1463_v60, 0.0  ;;  %v1476_v0 = vmul.f32 %v1472_v51, %v1463_v60  ;;  %v1458_v1 = vadd.f32 %v1457_v61, %v1360_v62 }
 0x417   : > { %1481 = vst.msk [vmem:[%s589_s16] sm:$0xff] %vm617_vm0, %v1477_v63 }
 0x418   : > { %v1480_v2 = vsel %vm1471_vm4, %v1463_v60, %v1476_v0  ;;  %vm1470_vm5 = vcmp.ge.f32.partialorder %v1458_v1, 0.0  ;;  %v1475_v3 = vmul.f32 %v1472_v51, %v1458_v1 }
 0x419   : > { %1484 = vst.msk [vmem:[%s589_s16 + $0x18] sm:$0xff] %vm617_vm0, %v1480_v2 }
 0x41a   : > { %v1479_v4 = vsel %vm1470_vm5, %v1458_v1, %v1475_v3 }
 0x41b   : > { %1483 = vst.msk [vmem:[%s589_s16 + $0x10] sm:$0xff] %vm617_vm0, %v1479_v4 }
 0x41c PF: > { %s26_s15 = sadd.s32 1, %s1861_s15  }
 0x41d   : > { %p23_p4 = scmp.ge.s32.totalorder %s26_s15, 4  }
 0x41f   :  { %25 = sbr.rel (!%p23_p4) target bundleno = 3 (0x3), region = 124 }

</bundles_post_ra>
